<compile_context>
chip_gen: v5e
topology: v5e:2x2
jax: 0.10.0
libtpu: 0.0.40
codegen_flags: <defaults>
</compile_context>

<pallas_src>
import functools

import jax
import jax.numpy as jnp
from jax.experimental import pallas as pl
from jax.experimental.pallas import tpu as pltpu

_LANE = 128       # lane width of the (rows, 128) slab (last dim)
_SUBLANE = 8      # f32 sublane granularity
_SUB_ROWS = 512   # rows per in-kernel sub-chunk (bounds VMEM temporaries)


def _round_up(a, b):
    return -(-a // b) * b


def _num_parallel_cores():
    """TensorCores a 'parallel' grid axis can shard over on this device."""
    try:
        kind = jax.devices()[0].device_kind.lower()
    except Exception:
        return 1
    # Dual-TensorCore devices: v4 / v5p megacore and v7x (2 TCs per chip).
    if any(tag in kind for tag in ("v4", "v5p", "v7", "7x")):
        return 2
    return 1


def _focal_loss_kernel(x_ref, t_ref, out_ref, *, gamma, chunk_rows, sub_rows,
                       chunks_per_core, valid_rows):
    i = pl.program_id(0)          # core axis ("parallel")
    j = pl.program_id(1)          # chunk axis within a core ("arbitrary")

    @pl.when(j == 0)
    def _():
        out_ref[...] = jnp.zeros_like(out_ref)

    blk = i * chunks_per_core + j          # raw (unclamped) chunk index
    row0 = blk * chunk_rows                # global row index of this block's first row
    n_sub = chunk_rows // sub_rows

    def sub_body(masked):
        def body(s, acc):
            r0 = pl.multiple_of(s * sub_rows, sub_rows)
            x = x_ref[pl.ds(r0, sub_rows), :].astype(jnp.float32)
            t = t_ref[pl.ds(r0, sub_rows), :].astype(jnp.float32)
            if masked:
                # Neutralize rows past the end of the un-padded input BEFORE
                # any transcendental: sentinel logit -> sigmoid=0, bce=0,
                # focal weight=0, so garbage tail reads contribute exactly 0.
                gi = row0 + r0 + jax.lax.broadcasted_iota(
                    jnp.int32, (sub_rows, _LANE), 0)
                keep = gi < valid_rows
                x = jnp.where(keep, x, -1e30)
                t = jnp.where(keep, t, 0.0)

            # Single exp per element, shared by the BCE log-term and sigmoid.
            e = jnp.exp(-jnp.abs(x))                             # EUP
            bce = jnp.maximum(x, 0.0) - x * t + jnp.log1p(e)     # stable BCE-with-logits
            denom = 1.0 + e
            r = pl.reciprocal(denom, approx=True)                # cheap EUP recip
            r = r * (2.0 - denom * r)                            # one Newton step -> ~f32 exact
            probs = jnp.where(x >= 0.0, r, e * r)                # sigmoid(x)

            # 1 - p_t, algebraically simplified (saves ~3 VPU ops/element).
            one_minus_pt = t + probs - 2.0 * t * probs

            # Specialize the focal exponent for common integer gammas.
            if gamma == 0.0:
                w = jnp.ones_like(one_minus_pt)
            elif gamma == float(int(gamma)) and 1.0 <= gamma <= 4.0:
                w = one_minus_pt
                for _ in range(int(gamma) - 1):
                    w = w * one_minus_pt
            else:
                w = one_minus_pt ** gamma

            loss = w * bce                                       # scalar alpha applied outside

            # VPU-only partial reduction into an (8, 128) accumulator (1 vreg).
            partial = loss.reshape(sub_rows // _SUBLANE, _SUBLANE, _LANE).sum(axis=0)
            return acc + partial
        return body

    def run(masked):
        acc = jax.lax.fori_loop(0, n_sub, sub_body(masked),
                                jnp.zeros((_SUBLANE, _LANE), jnp.float32))
        out_ref[...] += acc.reshape(1, _SUBLANE, _LANE)

    # Only the trailing block(s) ever need the mask; keep the hot path clean.
    needs_mask = row0 + chunk_rows > valid_rows

    @pl.when(jnp.logical_not(needs_mask))
    def _():
        run(False)

    @pl.when(needs_mask)
    def _():
        run(True)


def focal_loss(logits, targets, *, alpha=1.0, gamma=2.0, tile_rows=8192):
    """Sigmoid focal loss with reduction='mean' (matches the PyTorch module)."""
    assert logits.shape == targets.shape
    n_total = int(logits.size)
    assert n_total > 0

    # --- Lay the inputs out as a lane-dense (rows, 128) slab ----------------
    # Fast path: numel % 128 == 0 -> plain reshape, no pad copy, no extra HBM
    # round-trip.  Ragged sizes fall back to a minimal (<128 element) sentinel
    # pad; the sentinel makes the padded loss exactly 0 for any float dtype.
    if n_total % _LANE == 0:
        x2 = logits.reshape(-1, _LANE)
        t2 = targets.reshape(-1, _LANE)
    else:
        pad = _round_up(n_total, _LANE) - n_total
        if jnp.issubdtype(logits.dtype, jnp.floating):
            sentinel = float(jnp.finfo(logits.dtype).min)   # safe even for f16/bf16
        else:
            sentinel = -(10 ** 9)
        x2 = jnp.pad(logits.reshape(-1), (0, pad),
                     constant_values=sentinel).reshape(-1, _LANE)
        t2 = jnp.pad(targets.reshape(-1), (0, pad),
                     constant_values=0).reshape(-1, _LANE)

    rows = x2.shape[0]

    # --- Tiling: big DMA blocks, small in-kernel sub-chunks ------------------
    if rows <= tile_rows:
        chunk_rows = _round_up(rows, _SUBLANE)
        sub_rows = min(_SUB_ROWS, chunk_rows)
        chunk_rows = _round_up(chunk_rows, sub_rows)
    else:
        sub_rows = _SUB_ROWS
        chunk_rows = _round_up(min(tile_rows, rows), sub_rows)

    num_chunks = _round_up(rows, chunk_rows) // chunk_rows   # ceil-div
    ncores = max(1, min(_num_parallel_cores(), num_chunks))
    chunks_per_core = -(-num_chunks // ncores)

    kernel = functools.partial(
        _focal_loss_kernel, gamma=float(gamma), chunk_rows=chunk_rows,
        sub_rows=sub_rows, chunks_per_core=chunks_per_core, valid_rows=rows)

    def in_map(i, j):
        # Clamp so a trailing remainder block never starts out of bounds; the
        # kernel masks its contribution to zero using the unclamped index.
        blk = i * chunks_per_core + j
        return (jnp.minimum(blk, num_chunks - 1), 0)

    partials = pl.pallas_call(
        kernel,
        out_shape=jax.ShapeDtypeStruct((ncores, _SUBLANE, _LANE), jnp.float32),
        grid_spec=pltpu.PrefetchScalarGridSpec(
            num_scalar_prefetch=0,
            grid=(ncores, chunks_per_core),
            in_specs=[
                pl.BlockSpec((chunk_rows, _LANE), in_map),
                pl.BlockSpec((chunk_rows, _LANE), in_map),
            ],
            out_specs=pl.BlockSpec((1, _SUBLANE, _LANE), lambda i, j: (i, 0, 0)),
        ),
        compiler_params=pltpu.CompilerParams(
            dimension_semantics=("parallel", "arbitrary"),
            vmem_limit_bytes=40 * 1024 * 1024),
    )(x2, t2)

    # Tiny final cross-lane reduce + mean + scalar alpha outside the kernel.
    return jnp.float32(alpha) * jnp.sum(partials) / jnp.float32(n_total)


def focal_loss_ref(logits, targets, alpha=1.0, gamma=2.0):
    x = logits.astype(jnp.float32)
    t = targets.astype(jnp.float32)
    probs = jax.nn.sigmoid(x)
    bce = jnp.maximum(x, 0.0) - x * t + jnp.log1p(jnp.exp(-jnp.abs(x)))
    p_t = t * probs + (1.0 - t) * (1.0 - probs)
    return jnp.mean(alpha * (1.0 - p_t) ** gamma * bce)


if __name__ == "__main__":
    key = jax.random.PRNGKey(0)
    k1, k2 = jax.random.split(key)
    N, C = 16, 128  # small multi-label batch: 16 samples, 128 classes
    logits = jax.random.normal(k1, (N, C), dtype=jnp.float32) * 2.0
    targets = (jax.random.uniform(k2, (N, C)) > 0.5).astype(jnp.float32)

    out = focal_loss(logits, targets, alpha=1.0, gamma=2.0)
    out = jax.block_until_ready(out)

    ref = focal_loss_ref(logits, targets)
    assert jnp.allclose(out, ref, atol=1e-5, rtol=1e-4), (out, ref)
    print("KERNEL_OK")
</pallas_src>

<mosaic_0001>
module attributes {stable_mosaic.version = 11 : i64} {
  func.func @_focal_loss_kernel(%arg0: i32, %arg1: i32, %arg2: memref<16x128xf32, #tpu.memory_space<vmem>>, %arg3: memref<16x128xf32, #tpu.memory_space<vmem>>, %arg4: memref<1x8x128xf32, #tpu.memory_space<vmem>>) attributes {dimension_semantics = [#tpu.dimension_semantics<parallel>, #tpu.dimension_semantics<arbitrary>], iteration_bounds = array<i64: 1, 1>, scalar_prefetch = 0 : i64, scratch_operands = 0 : i64, tpu.core_type = #tpu.core_type<tc>, window_params = [{transform_indices = @transform_0, window_bounds = array<i64: 16, 128>}, {transform_indices = @transform_1, window_bounds = array<i64: 16, 128>}, {transform_indices = @transform_2, window_bounds = array<i64: 1, 8, 128>}]} {
    %c0_i32 = arith.constant 0 : i32
    %0 = arith.cmpi eq, %arg1, %c0_i32 : i32
    %1 = arith.extui %0 : i1 to i32
    %c0_i32_0 = arith.constant 0 : i32
    %2 = arith.cmpi ne, %1, %c0_i32_0 : i32
    scf.if %2 {
      %cst = arith.constant 0.000000e+00 : f32
      %13 = vector.broadcast %cst : f32 to vector<1x8x128xf32>
      %c0 = arith.constant 0 : index
      %c0_5 = arith.constant 0 : index
      %c0_6 = arith.constant 0 : index
      %14 = vector.load %arg4[%c0, %c0_5, %c0_6] : memref<1x8x128xf32, #tpu.memory_space<vmem>>, vector<1x8x128xf32>
      tpu.vector_store %arg4[%c0, %c0_5, %c0_6], %13 {strides = array<i32>} : memref<1x8x128xf32, #tpu.memory_space<vmem>>, vector<1x8x128xf32>,
    } else {
    }
    %c1_i32 = arith.constant 1 : i32
    %3 = arith.muli %arg0, %c1_i32 : i32
    %4 = arith.addi %3, %arg1 : i32
    %c16_i32 = arith.constant 16 : i32
    %5 = arith.muli %4, %c16_i32 : i32
    %c16_i32_1 = arith.constant 16 : i32
    %6 = arith.addi %5, %c16_i32_1 : i32
    %c16_i32_2 = arith.constant 16 : i32
    %7 = arith.cmpi sgt, %6, %c16_i32_2 : i32
    %true = arith.constant true
    %8 = arith.xori %7, %true : i1
    %9 = arith.extui %8 : i1 to i32
    %c0_i32_3 = arith.constant 0 : i32
    %10 = arith.cmpi ne, %9, %c0_i32_3 : i32
    scf.if %10 {
      %cst = arith.constant 0.000000e+00 : f32
      %13 = vector.broadcast %cst : f32 to vector<8x128xf32>
      %c0_i32_5 = arith.constant 0 : i32
      %c16_i32_6 = arith.constant 16 : i32
      %14 = arith.muli %c0_i32_5, %c16_i32_6 : i32
      %15 = tpu.assume_multiple %14, 16 : i32
      %16 = arith.index_cast %15 : i32 to index
      %c0 = arith.constant 0 : index
      %17 = vector.load %arg2[%16, %c0] : memref<16x128xf32, #tpu.memory_space<vmem>>, vector<16x128xf32>
      %18 = arith.index_cast %15 : i32 to index
      %c0_7 = arith.constant 0 : index
      %19 = vector.load %arg3[%18, %c0_7] : memref<16x128xf32, #tpu.memory_space<vmem>>, vector<16x128xf32>
      %20 = math.absf %17 : vector<16x128xf32>
      %cst_8 = arith.constant 0.000000e+00 : f32
      %21 = vector.broadcast %cst_8 : f32 to vector<16x128xf32>
      %22 = arith.subf %21, %20 : vector<16x128xf32>
      %23 = math.exp %22 : vector<16x128xf32>
      %cst_9 = arith.constant 0.000000e+00 : f32
      %24 = vector.broadcast %cst_9 : f32 to vector<16x128xf32>
      %25 = arith.maximumf %17, %24 : vector<16x128xf32>
      %26 = arith.mulf %17, %19 : vector<16x128xf32>
      %27 = arith.subf %25, %26 : vector<16x128xf32>
      %28 = math.log1p %23 : vector<16x128xf32>
      %29 = arith.addf %27, %28 : vector<16x128xf32>
      %cst_10 = arith.constant 1.000000e+00 : f32
      %30 = vector.broadcast %cst_10 : f32 to vector<16x128xf32>
      %31 = arith.addf %30, %23 : vector<16x128xf32>
      %32 = tpu.reciprocal %31 {approx = true} : vector<16x128xf32> -> vector<16x128xf32>
      %33 = arith.mulf %31, %32 : vector<16x128xf32>
      %cst_11 = arith.constant 2.000000e+00 : f32
      %34 = vector.broadcast %cst_11 : f32 to vector<16x128xf32>
      %35 = arith.subf %34, %33 : vector<16x128xf32>
      %36 = arith.mulf %32, %35 : vector<16x128xf32>
      %cst_12 = arith.constant 0.000000e+00 : f32
      %37 = vector.broadcast %cst_12 : f32 to vector<16x128xf32>
      %38 = arith.cmpf oge, %17, %37 : vector<16x128xf32>
      %39 = arith.mulf %23, %36 : vector<16x128xf32>
      %40 = arith.select %38, %36, %39 : vector<16x128xi1>, vector<16x128xf32>
      %41 = arith.addf %19, %40 : vector<16x128xf32>
      %cst_13 = arith.constant 2.000000e+00 : f32
      %42 = vector.broadcast %cst_13 : f32 to vector<16x128xf32>
      %43 = arith.mulf %42, %19 : vector<16x128xf32>
      %44 = arith.mulf %43, %40 : vector<16x128xf32>
      %45 = arith.subf %41, %44 : vector<16x128xf32>
      %46 = arith.mulf %45, %45 : vector<16x128xf32>
      %47 = arith.mulf %46, %29 : vector<16x128xf32>
      %48 = vector.shape_cast %47 : vector<16x128xf32> to vector<2x8x128xf32>
      %cst_14 = arith.constant dense<0.000000e+00> : vector<8x128xf32>
      %49 = vector.multi_reduction <add>, %48, %cst_14 [0] : vector<2x8x128xf32> to vector<8x128xf32>
      %50 = arith.addf %13, %49 : vector<8x128xf32>
      %c1_i32_15 = arith.constant 1 : i32
      %c0_16 = arith.constant 0 : index
      %c0_17 = arith.constant 0 : index
      %c0_18 = arith.constant 0 : index
      %51 = vector.load %arg4[%c0_16, %c0_17, %c0_18] : memref<1x8x128xf32, #tpu.memory_space<vmem>>, vector<1x8x128xf32>
      %52 = vector.shape_cast %50 : vector<8x128xf32> to vector<1x8x128xf32>
      %53 = arith.addf %51, %52 : vector<1x8x128xf32>
      %c0_19 = arith.constant 0 : index
      %c0_20 = arith.constant 0 : index
      %c0_21 = arith.constant 0 : index
      %54 = vector.load %arg4[%c0_19, %c0_20, %c0_21] : memref<1x8x128xf32, #tpu.memory_space<vmem>>, vector<1x8x128xf32>
      tpu.vector_store %arg4[%c0_19, %c0_20, %c0_21], %53 {strides = array<i32>} : memref<1x8x128xf32, #tpu.memory_space<vmem>>, vector<1x8x128xf32>,
    } else {
    }
    %11 = arith.extui %7 : i1 to i32
    %c0_i32_4 = arith.constant 0 : i32
    %12 = arith.cmpi ne, %11, %c0_i32_4 : i32
    scf.if %12 {
      %cst = arith.constant 0.000000e+00 : f32
      %13 = vector.broadcast %cst : f32 to vector<8x128xf32>
      %c0_i32_5 = arith.constant 0 : i32
      %c16_i32_6 = arith.constant 16 : i32
      %14 = arith.muli %c0_i32_5, %c16_i32_6 : i32
      %15 = tpu.assume_multiple %14, 16 : i32
      %16 = arith.index_cast %15 : i32 to index
      %c0 = arith.constant 0 : index
      %17 = vector.load %arg2[%16, %c0] : memref<16x128xf32, #tpu.memory_space<vmem>>, vector<16x128xf32>
      %18 = arith.index_cast %15 : i32 to index
      %c0_7 = arith.constant 0 : index
      %19 = vector.load %arg3[%18, %c0_7] : memref<16x128xf32, #tpu.memory_space<vmem>>, vector<16x128xf32>
      %20 = arith.addi %5, %15 : i32
      %21 = tpu.iota {dimensions = array<i32: 0>} : vector<16x128xi32>
      %22 = vector.broadcast %20 : i32 to vector<16x128xi32>
      %23 = arith.addi %22, %21 : vector<16x128xi32>
      %c16_i32_8 = arith.constant 16 : i32
      %24 = vector.broadcast %c16_i32_8 : i32 to vector<16x128xi32>
      %25 = arith.cmpi slt, %23, %24 : vector<16x128xi32>
      %cst_9 = arith.constant -1.000000e+30 : f32
      %26 = vector.broadcast %cst_9 : f32 to vector<16x128xf32>
      %27 = arith.select %25, %17, %26 : vector<16x128xi1>, vector<16x128xf32>
      %cst_10 = arith.constant 0.000000e+00 : f32
      %28 = vector.broadcast %cst_10 : f32 to vector<16x128xf32>
      %29 = arith.select %25, %19, %28 : vector<16x128xi1>, vector<16x128xf32>
      %30 = math.absf %27 : vector<16x128xf32>
      %cst_11 = arith.constant 0.000000e+00 : f32
      %31 = vector.broadcast %cst_11 : f32 to vector<16x128xf32>
      %32 = arith.subf %31, %30 : vector<16x128xf32>
      %33 = math.exp %32 : vector<16x128xf32>
      %cst_12 = arith.constant 0.000000e+00 : f32
      %34 = vector.broadcast %cst_12 : f32 to vector<16x128xf32>
      %35 = arith.maximumf %27, %34 : vector<16x128xf32>
      %36 = arith.mulf %27, %29 : vector<16x128xf32>
      %37 = arith.subf %35, %36 : vector<16x128xf32>
      %38 = math.log1p %33 : vector<16x128xf32>
      %39 = arith.addf %37, %38 : vector<16x128xf32>
      %cst_13 = arith.constant 1.000000e+00 : f32
      %40 = vector.broadcast %cst_13 : f32 to vector<16x128xf32>
      %41 = arith.addf %40, %33 : vector<16x128xf32>
      %42 = tpu.reciprocal %41 {approx = true} : vector<16x128xf32> -> vector<16x128xf32>
      %43 = arith.mulf %41, %42 : vector<16x128xf32>
      %cst_14 = arith.constant 2.000000e+00 : f32
      %44 = vector.broadcast %cst_14 : f32 to vector<16x128xf32>
      %45 = arith.subf %44, %43 : vector<16x128xf32>
      %46 = arith.mulf %42, %45 : vector<16x128xf32>
      %cst_15 = arith.constant 0.000000e+00 : f32
      %47 = vector.broadcast %cst_15 : f32 to vector<16x128xf32>
      %48 = arith.cmpf oge, %27, %47 : vector<16x128xf32>
      %49 = arith.mulf %33, %46 : vector<16x128xf32>
      %50 = arith.select %48, %46, %49 : vector<16x128xi1>, vector<16x128xf32>
      %51 = arith.addf %29, %50 : vector<16x128xf32>
      %cst_16 = arith.constant 2.000000e+00 : f32
      %52 = vector.broadcast %cst_16 : f32 to vector<16x128xf32>
      %53 = arith.mulf %52, %29 : vector<16x128xf32>
      %54 = arith.mulf %53, %50 : vector<16x128xf32>
      %55 = arith.subf %51, %54 : vector<16x128xf32>
      %56 = arith.mulf %55, %55 : vector<16x128xf32>
      %57 = arith.mulf %56, %39 : vector<16x128xf32>
      %58 = vector.shape_cast %57 : vector<16x128xf32> to vector<2x8x128xf32>
      %cst_17 = arith.constant dense<0.000000e+00> : vector<8x128xf32>
      %59 = vector.multi_reduction <add>, %58, %cst_17 [0] : vector<2x8x128xf32> to vector<8x128xf32>
      %60 = arith.addf %13, %59 : vector<8x128xf32>
      %c1_i32_18 = arith.constant 1 : i32
      %c0_19 = arith.constant 0 : index
      %c0_20 = arith.constant 0 : index
      %c0_21 = arith.constant 0 : index
      %61 = vector.load %arg4[%c0_19, %c0_20, %c0_21] : memref<1x8x128xf32, #tpu.memory_space<vmem>>, vector<1x8x128xf32>
      %62 = vector.shape_cast %60 : vector<8x128xf32> to vector<1x8x128xf32>
      %63 = arith.addf %61, %62 : vector<1x8x128xf32>
      %c0_22 = arith.constant 0 : index
      %c0_23 = arith.constant 0 : index
      %c0_24 = arith.constant 0 : index
      %64 = vector.load %arg4[%c0_22, %c0_23, %c0_24] : memref<1x8x128xf32, #tpu.memory_space<vmem>>, vector<1x8x128xf32>
      tpu.vector_store %arg4[%c0_22, %c0_23, %c0_24], %63 {strides = array<i32>} : memref<1x8x128xf32, #tpu.memory_space<vmem>>, vector<1x8x128xf32>,
    } else {
    }
    return
  }
  func.func @transform_0(%arg0: i32, %arg1: i32) -> (i32, i32) {
    %c1_i32 = arith.constant 1 : i32
    %0 = arith.muli %arg0, %c1_i32 : i32
    %1 = arith.addi %0, %arg1 : i32
    %c0_i32 = arith.constant 0 : i32
    %2 = arith.minsi %1, %c0_i32 : i32
    %c0_i32_0 = arith.constant 0 : i32
    %c0_i32_1 = arith.constant 0 : i32
    return %2, %c0_i32_0 : i32, i32
  }
  func.func @transform_1(%arg0: i32, %arg1: i32) -> (i32, i32) {
    %c1_i32 = arith.constant 1 : i32
    %0 = arith.muli %arg0, %c1_i32 : i32
    %1 = arith.addi %0, %arg1 : i32
    %c0_i32 = arith.constant 0 : i32
    %2 = arith.minsi %1, %c0_i32 : i32
    %c0_i32_0 = arith.constant 0 : i32
    %c0_i32_1 = arith.constant 0 : i32
    return %2, %c0_i32_0 : i32, i32
  }
  func.func @transform_2(%arg0: i32, %arg1: i32) -> (i32, i32, i32) {
    %c0_i32 = arith.constant 0 : i32
    %c0_i32_0 = arith.constant 0 : i32
    %c0_i32_1 = arith.constant 0 : i32
    return %arg0, %c0_i32, %c0_i32_0 : i32, i32, i32
  }
}

</mosaic_0001>

<bundles_post_ra>
// kernel: tpu_custom_call.1
= control target key start
LH: loop header
LB: loop body
LE: loop exit
PB: predicated region body
PF: predicated region fallthrough
CT: control target
= control target key end

     0   :  { %7 = vsyncpa [#allocation3], 0  ;;  %s395_s0 = inlined_call_operand.hbm [shape: f32[16,128], index: 0, kind: input, shape index: {}]   ;;  %s396_s1 = inlined_call_operand.hbm [shape: f32[16,128], index: 1, kind: input, shape index: {}]   ;;  %s397_s2 = inlined_call_operand.hbm [shape: f32[1,8,128], index: 2, kind: output, shape index: {}]  }
   0x1   :  { %8 = vsyncpa [#allocation6], 0 }
   0x2   :  { %9 = vsyncpa [#allocation4], 0  ;;  %s20_s11 = sshll.u32 %s395_s0, 4  ;;  %s353_s12 = smov [#allocation2]   ;;  %s21_s11 = int_to_ptr.hbm [resolvable:$true] %s20_s11 }
   0x3   :  { %s22_s13 = sshll.u32 %s353_s12, 4  ;;  %s39_s16 = sshll.u32 %s396_s1, 4  ;;  %s23_s13 = int_to_ptr.vmem [resolvable:$true] %s22_s13  ;;  %s40_s16 = int_to_ptr.hbm [resolvable:$true] %s39_s16 }
   0x4   :  { %s354_s17 = smov 128   ;;  %s355_s18 = smov 8  }
   0x5   :  { %28 = dma.hbm_to_vmem [thread:$0]  %s21_s11, 256, %s23_s13, [#allocation3], %s354_s17, %s354_s17, %s355_s18  }
   0x6   :  { %s356_s19 = smov [#allocation5]  }
   0x7   :  { %s41_s20 = sshll.u32 %s356_s19, 4  ;;  %s42_s20 = int_to_ptr.vmem [resolvable:$true] %s41_s20 }
   0x8   :  { %47 = dma.hbm_to_vmem [thread:$0]  %s40_s16, 256, %s42_s20, [#allocation6], %s354_s17, %s354_s17, %s355_s18  }
   0x9   :  { %347 = dma.done.wait [#allocation3], 256  }
   0xa   :  { %348 = vsyncadd [#allocation3], 4294967040 }
   0xb   :  { %349 = dma.done.wait [#allocation6], 256  }
   0xc   :  { %350 = vsyncadd [#allocation6], 4294967040  ;;  %v77_v0 = vld [vmem:[#allocation2] sm:$0xff]  ;;  %v78_v1 = vld [vmem:[#allocation2 + $0x8] sm:$0xff]  ;;  %s357_s0 = smov [#allocation7]   ;;  %s242_s23 = sshll.u32 %s397_s2, 4  ;;  %s243_s23 = int_to_ptr.hbm [resolvable:$true] %s242_s23 }
   0xd   :  { %v81_v2 = vand.u32 2147483647, %v77_v0  ;;  %v82_v3 = vand.u32 2147483647, %v78_v1  ;;  %v79_v19 = vld [vmem:[#allocation5] sm:$0xff]  ;;  %v80_v24 = vld [vmem:[#allocation5 + $0x8] sm:$0xff] }
   0xe   :  { %v89_v25 = vmax.f32 %v77_v0, 0.0  ;;  %v91_v26 = vmul.f32 %v79_v19, %v77_v0  ;;  %v90_v29 = vmax.f32 %v78_v1, 0.0  ;;  %v92_v30 = vmul.f32 %v80_v24, %v78_v1  ;;  %s240_s1 = sshll.u32 %s357_s0, 4  ;;  %s241_s1 = int_to_ptr.vmem [resolvable:$true] %s240_s1 }
   0xf   :  { %v83_v4 = vsub.f32 0.0, %v81_v2  ;;  %v84_v5 = vsub.f32 0.0, %v82_v3  ;;  %vm125_vm0 = vcmp.ge.f32.partialorder %v77_v0, 0.0  ;;  %v133_v35 = vmul.f32 2.0, %v79_v19 }
  0x10   :  { %vm126_vm3 = vcmp.ge.f32.partialorder %v78_v1, 0.0  ;;  %v134_v42 = vmul.f32 2.0, %v80_v24  ;;  %v93_v43 = vsub.f32 %v89_v25, %v91_v26  ;;  %v94_v45 = vsub.f32 %v90_v29, %v92_v30 }
  0x11   :  { %v85_v6 = vmul.f32 1.442695, %v83_v4  ;;  %v87_v7 = vmul.f32 1.442695, %v84_v5 }
  0x13   :  { %263 = vpow2.f32 %v85_v6 }
  0x14   :  { %265 = vpow2.f32 %v87_v7 }
  0x19   :  { %v264_v8 = vpop.eup %263 }
  0x1a   :  { %v266_v9 = vpop.eup %265  ;;  %v95_v10 = vadd.f32 1.0, %v264_v8  ;;  %v98_v12 = vmul.f32 -0.5, %v264_v8  ;;  %v101_v20 = vand.u32 2147483647, %v264_v8 }
  0x1b   :  { %v104_v11 = vadd.f32 1.0, %v266_v9  ;;  %v107_v13 = vmul.f32 -0.5, %v266_v9  ;;  %v110_v27 = vand.u32 2147483647, %v266_v9 }
  0x1c   :  { %267 = vrcp.f32 %v95_v10  ;;  %v99_v16 = vadd.f32 1.0, %v98_v12  ;;  %vm379_vm1 = vcmp.lt.f32.partialorder %v101_v20, 0.0004427343 }
  0x1d   :  { %269 = vrcp.f32 %v104_v11  ;;  %v108_v21 = vadd.f32 1.0, %v107_v13  ;;  %vm383_vm2 = vcmp.lt.f32.partialorder %v110_v27, 0.0004427343 }
  0x1e   :  { %271 = vlog2.f32 %v95_v10  ;;  %v100_v33 = vmul.f32 %v264_v8, %v99_v16 }
  0x1f   :  { %273 = vlog2.f32 %v104_v11  ;;  %v109_v38 = vmul.f32 %v266_v9, %v108_v21 }
  0x22   :  { %v268_v14 = vpop.eup %267 }
  0x23   :  { %v270_v15 = vpop.eup %269  ;;  %v119_v17 = vmul.f32 %v268_v14, %v95_v10 }
  0x24   :  { %v272_v18 = vpop.eup %271  ;;  %v120_v22 = vmul.f32 %v270_v15, %v104_v11 }
  0x25   :  { %v274_v23 = vpop.eup %273  ;;  %v121_v28 = vsub.f32 2.0, %v119_v17  ;;  %v97_v32 = vmul.f32 0.6931472, %v272_v18 }
  0x26   :  { %v122_v31 = vsub.f32 2.0, %v120_v22  ;;  %v106_v37 = vmul.f32 0.6931472, %v274_v23 }
  0x27   :  { %v123_v34 = vmul.f32 %v268_v14, %v121_v28  ;;  %v103_v46 = vsel %vm379_vm1, %v100_v33, %v97_v32 }
  0x28   :  { %v124_v39 = vmul.f32 %v270_v15, %v122_v31  ;;  %v112_v48 = vsel %vm383_vm2, %v109_v38, %v106_v37  ;;  %v113_v54 = vadd.f32 %v103_v46, %v93_v43 }
  0x29   :  { %v127_v41 = vmul.f32 %v264_v8, %v123_v34  ;;  %v114_v56 = vadd.f32 %v112_v48, %v94_v45 }
  0x2a   :  { %v128_v44 = vmul.f32 %v266_v9, %v124_v39 }
  0x2b   :  { %v129_v47 = vsel %vm125_vm0, %v123_v34, %v127_v41 }
  0x2c   :  { %v130_v49 = vsel %vm126_vm3, %v124_v39, %v128_v44  ;;  %v131_v50 = vadd.f32 %v129_v47, %v79_v19  ;;  %v135_v51 = vmul.f32 %v133_v35, %v129_v47 }
  0x2d   :  { %v132_v52 = vadd.f32 %v130_v49, %v80_v24  ;;  %v136_v53 = vmul.f32 %v134_v42, %v130_v49 }
  0x2e   :  { %v137_v55 = vsub.f32 %v131_v50, %v135_v51 }
  0x2f   :  { %v138_v57 = vsub.f32 %v132_v52, %v136_v53 }
  0x30   :  { %v139_v58 = vmul.f32 %v137_v55, %v137_v55 }
  0x31   :  { %v140_v59 = vmul.f32 %v138_v57, %v138_v57 }
  0x32   :  { %v141_v60 = vmul.f32 %v139_v58, %v113_v54 }
  0x33   :  { %v142_v61 = vmul.f32 %v140_v59, %v114_v56 }
  0x35   :  { %v143_v62 = vadd.f32 %v142_v61, %v141_v60 }
  0x37   :  { %147 = vst [vmem:[#allocation7] sm:$0xff] %v143_v62 }
  0x38   :  { %245 = dma.vmem_to_hbm [thread:$0]  %s241_s1, 128, %s243_s23, [#allocation4]  }
  0x39   :  { %351 = dma.done.wait [#allocation4], 128  }
  0x3a   :  { %352 = vsyncadd [#allocation4], 4294967168 }
  0x3b   :  { %250 = vsyncpa [#allocation3], 1 }
  0x3c   :  { %251 = vsyncpa [#allocation6], 1 }
  0x3d   :  { %252 = vsyncpa [#allocation4], 1 }

</bundles_post_ra>
